<compile_context>
chip_gen: v7x
topology: tpu7x:2x2x1
jax: 0.10.0
libtpu: 0.0.40
codegen_flags: <defaults>
</compile_context>

<pallas_src>
import functools

import jax
import jax.numpy as jnp
from jax import lax
from jax.experimental import pallas as pl
from jax.experimental.pallas import tpu as pltpu


def _round_up(v, m):
    return (v + m - 1) // m * m


def _sublane_multiple(itemsize):
    # f32 -> 8, bf16 -> 16, int8/fp8 -> 32 (sub-32-bit dtypes pack sublanes).
    return 8 * max(1, 4 // itemsize)


def _pick_c_tile(C, padded_rest_elems, itemsize, *, multiple_of=1,
                 budget_bytes=4 << 20):
    """Largest divisor of C (respecting `multiple_of`) whose padded block fits."""
    def fits(t):
        return t * padded_rest_elems * itemsize <= budget_bytes
    if fits(C):
        return C
    best = None
    t = multiple_of
    while t < C:
        if C % t == 0 and fits(t):
            best = t
        t += multiple_of
    return best if best is not None else C


def _guide_mask_kernel(sxi_ref, syi_ref, x_ref, keep_ref, acc_ref,
                       *, rh, rw, Hn, Wn):
    # sxi_ref/syi_ref: (B,) int32 in SMEM (scalar prefetch).
    # x_ref: (1, tc, H, W) native dtype;  keep_ref: (1, H, W) native dtype,
    # resident over the c axis;  acc_ref: (H, W) f32 scratch accumulator.
    b = pl.program_id(0)
    c = pl.program_id(1)

    part = jnp.sum(x_ref[0].astype(jnp.float32), axis=0)            # (H, W)

    @pl.when(c == 0)
    def _():
        acc_ref[...] = part

    @pl.when(c > 0)
    def _():
        acc_ref[...] = acc_ref[...] + part

    @pl.when(c == pl.num_programs(1) - 1)
    def _():
        s = acc_ref[...]                                             # full channel sum
        # 3x3 zero-padded box sum as two banded matmuls: box = Ah @ s @ Aw,
        # A[i,j] = 1 iff |i-j| <= 1 (zero padding at borders falls out).
        ih = lax.broadcasted_iota(jnp.int32, (Hn, Hn), 0)
        jh = lax.broadcasted_iota(jnp.int32, (Hn, Hn), 1)
        Ah = (jnp.abs(ih - jh) <= 1).astype(jnp.float32)
        iw = lax.broadcasted_iota(jnp.int32, (Wn, Wn), 0)
        jw = lax.broadcasted_iota(jnp.int32, (Wn, Wn), 1)
        Aw = (jnp.abs(iw - jw) <= 1).astype(jnp.float32)
        box = jnp.dot(jnp.dot(Ah, s, preferred_element_type=jnp.float32), Aw,
                      preferred_element_type=jnp.float32)
        # f_x = sigmoid(box / (9*C)); its argmax positions equal argmax(box)
        # (monotone sigmoid, positive scale), so divide + sigmoid are skipped.
        h_iota = lax.broadcasted_iota(jnp.int32, (Hn, Wn), 0)
        w_iota = lax.broadcasted_iota(jnp.int32, (Hn, Wn), 1)
        sx_i = sxi_ref[b]            # random row index in [0, H - rh)
        sy_i = syi_ref[b]            # random col index in [0, W - rw)
        big = jnp.int32(Hn + Wn)

        # sx = first argmax over W of f_x[sx_i, :]   (column index, used on H)
        row_sel = jnp.where(h_iota == sx_i, box, -jnp.inf)
        row_max = jnp.max(row_sel, keepdims=True)                    # (1, 1)
        sx = jnp.min(jnp.where((h_iota == sx_i) & (row_sel == row_max),
                               w_iota, big), keepdims=True)          # (1, 1)
        # sy = first argmax over H of f_x[:, sy_i]   (row index, used on W)
        col_sel = jnp.where(w_iota == sy_i, box, -jnp.inf)
        col_max = jnp.max(col_sel, keepdims=True)
        sy = jnp.min(jnp.where((w_iota == sy_i) & (col_sel == col_max),
                               h_iota, big), keepdims=True)

        # mask[:, sx:sx+rh, sy:sy+rw] = 0  (python-slice clipping is implicit).
        in_h = (h_iota >= sx) & (h_iota < sx + rh)
        in_w = (w_iota >= sy) & (w_iota < sy + rw)
        keep_ref[0] = jnp.where(in_h & in_w, 0.0, 1.0).astype(keep_ref.dtype)


def _apply_kernel(x_ref, m_ref, o_ref):
    # x_ref: (1, tc, H*W); m_ref: (1, 1, H*W) keep-map; o_ref: (1, tc, H*W)
    o_ref[...] = x_ref[...] * m_ref[...]


def featguide_drop_forward(x, *, base_ratio=0.01, rng_key=None, training=True):
    """JAX/Pallas port of FeatGuide_Drop.forward (NCHW input)."""
    if not training:
        return x
    if rng_key is None:
        rng_key = jax.random.PRNGKey(0)

    B, C, H, W = x.shape
    h_ratio = base_ratio * 1
    w_ratio = base_ratio * 2
    rh = int(h_ratio * H)
    rw = int(w_ratio * W)
    itemsize = jnp.dtype(x.dtype).itemsize
    sub = _sublane_multiple(itemsize)

    # TODO(synk): torch.randint has no clean in-kernel Mosaic equivalent with a
    # CPU-interpretable lowering; per-batch start indices stay in plain JAX and
    # are fed to kernel 1 via scalar prefetch (SMEM).
    kx, ky = jax.random.split(rng_key)
    sx_i = jax.random.randint(kx, (B,), 0, H - rh, dtype=jnp.int32)
    sy_i = jax.random.randint(ky, (B,), 0, W - rw, dtype=jnp.int32)

    # ---- kernel 1: guided keep-map (channel sum -> 3x3 box -> argmax -> mask) ----
    pad_hw = _round_up(H, sub) * _round_up(W, 128)
    tc1 = _pick_c_tile(C, pad_hw, itemsize)
    keep = pl.pallas_call(
        functools.partial(_guide_mask_kernel, rh=rh, rw=rw, Hn=H, Wn=W),
        out_shape=jax.ShapeDtypeStruct((B, H, W), x.dtype),
        grid_spec=pltpu.PrefetchScalarGridSpec(
            num_scalar_prefetch=2,
            grid=(B, C // tc1),
            in_specs=[pl.BlockSpec((1, tc1, H, W),
                                   lambda b, c, sxi, syi: (b, c, 0, 0))],
            out_specs=pl.BlockSpec((1, H, W), lambda b, c, sxi, syi: (b, 0, 0)),
            scratch_shapes=[pltpu.VMEM((H, W), jnp.float32)],
        ),
        compiler_params=pltpu.CompilerParams(
            dimension_semantics=("parallel", "arbitrary")),
    )(sx_i, sy_i, x)

    # ---- kernel 2: lane-dense masked multiply (out = x * keep) ----
    xf = x.reshape(B, C, H * W)                       # free, contiguous reshape
    mmap = keep.reshape(B, 1, H * W)                  # free, contiguous reshape
    pad_flat = _round_up(H * W, 128)
    tc2 = _pick_c_tile(C, pad_flat, itemsize, multiple_of=sub)
    out = pl.pallas_call(
        _apply_kernel,
        out_shape=jax.ShapeDtypeStruct((B, C, H * W), x.dtype),
        grid_spec=pltpu.PrefetchScalarGridSpec(
            num_scalar_prefetch=0,
            grid=(B, C // tc2),
            in_specs=[
                pl.BlockSpec((1, tc2, H * W), lambda b, c: (b, c, 0)),
                pl.BlockSpec((1, 1, H * W), lambda b, c: (b, 0, 0)),
            ],
            out_specs=pl.BlockSpec((1, tc2, H * W), lambda b, c: (b, c, 0)),
        ),
        compiler_params=pltpu.CompilerParams(
            dimension_semantics=("parallel", "parallel")),
    )(xf, mmap)
    return out.reshape(B, C, H, W)


if __name__ == "__main__":
    root = jax.random.PRNGKey(0)
    k_x, k_drop = jax.random.split(root)
    B, C, H, W = 2, 4, 16, 16
    x = jax.random.normal(k_x, (B, C, H, W), dtype=jnp.float32)

    # base_ratio=0.25 gives rh=4, rw=8 at 16x16 so the drop path is exercised;
    # the module default (0.01) yields rh=rw=0 (identity mask) at this size.
    y = featguide_drop_forward(x, base_ratio=0.25, rng_key=k_drop, training=True)
    jax.block_until_ready(y)

    assert y.shape == (B, C, H, W)
    assert bool(jnp.all(jnp.isfinite(y)))
    assert bool(jnp.any(y == 0.0))                      # a block actually got dropped
    assert bool(jnp.all((y == x) | (y == 0.0)))         # pass-through outside the block

    # Default-ratio path: rh = rw = 0 -> identity (matches the torch module).
    y_id = featguide_drop_forward(x, base_ratio=0.01, rng_key=k_drop, training=True)
    jax.block_until_ready(y_id)
    assert bool(jnp.all(y_id == x))

    # Eval mode is a passthrough.
    y_eval = featguide_drop_forward(x, base_ratio=0.25, rng_key=k_drop, training=False)
    assert y_eval is x

    print("KERNEL_OK")
</pallas_src>

<mosaic_0001>
module attributes {stable_mosaic.version = 11 : i64} {
  func.func @_guide_mask_kernel(%arg0: i32, %arg1: i32, %arg2: memref<2xi32, #tpu.memory_space<smem>>, %arg3: memref<2xi32, #tpu.memory_space<smem>>, %arg4: memref<1x4x16x16xf32, #tpu.memory_space<vmem>>, %arg5: memref<1x16x16xf32, #tpu.memory_space<vmem>>, %arg6: memref<16x16xf32, #tpu.memory_space<vmem>>) attributes {dimension_semantics = [#tpu.dimension_semantics<parallel>, #tpu.dimension_semantics<arbitrary>], iteration_bounds = array<i64: 2, 1>, scalar_prefetch = 2 : i64, scratch_operands = 1 : i64, tpu.core_type = #tpu.core_type<tc>, window_params = [{transform_indices = @transform_0, window_bounds = array<i64: 1, 4, 16, 16>}, {transform_indices = @transform_1, window_bounds = array<i64: 1, 16, 16>}]} {
    %c0 = arith.constant 0 : index
    %c0_0 = arith.constant 0 : index
    %c0_1 = arith.constant 0 : index
    %c0_2 = arith.constant 0 : index
    %0 = vector.load %arg4[%c0, %c0_0, %c0_1, %c0_2] : memref<1x4x16x16xf32, #tpu.memory_space<vmem>>, vector<1x4x16x16xf32>
    %1 = vector.shape_cast %0 : vector<1x4x16x16xf32> to vector<4x16x16xf32>
    %cst = arith.constant dense<0.000000e+00> : vector<16x16xf32>
    %2 = vector.multi_reduction <add>, %1, %cst [0] : vector<4x16x16xf32> to vector<16x16xf32>
    %c0_i32 = arith.constant 0 : i32
    %3 = arith.cmpi eq, %arg1, %c0_i32 : i32
    %4 = arith.extui %3 : i1 to i32
    %c0_i32_3 = arith.constant 0 : i32
    %5 = arith.cmpi ne, %4, %c0_i32_3 : i32
    scf.if %5 {
      %c0_8 = arith.constant 0 : index
      %c0_9 = arith.constant 0 : index
      %12 = vector.load %arg6[%c0_8, %c0_9] : memref<16x16xf32, #tpu.memory_space<vmem>>, vector<16x16xf32>
      tpu.vector_store %arg6[%c0_8, %c0_9], %2 {strides = array<i32>} : memref<16x16xf32, #tpu.memory_space<vmem>>, vector<16x16xf32>,
    } else {
    }
    %c0_i32_4 = arith.constant 0 : i32
    %6 = arith.cmpi sgt, %arg1, %c0_i32_4 : i32
    %7 = arith.extui %6 : i1 to i32
    %c0_i32_5 = arith.constant 0 : i32
    %8 = arith.cmpi ne, %7, %c0_i32_5 : i32
    scf.if %8 {
      %c0_8 = arith.constant 0 : index
      %c0_9 = arith.constant 0 : index
      %12 = vector.load %arg6[%c0_8, %c0_9] : memref<16x16xf32, #tpu.memory_space<vmem>>, vector<16x16xf32>
      %13 = arith.addf %12, %2 : vector<16x16xf32>
      %c0_10 = arith.constant 0 : index
      %c0_11 = arith.constant 0 : index
      %14 = vector.load %arg6[%c0_10, %c0_11] : memref<16x16xf32, #tpu.memory_space<vmem>>, vector<16x16xf32>
      tpu.vector_store %arg6[%c0_10, %c0_11], %13 {strides = array<i32>} : memref<16x16xf32, #tpu.memory_space<vmem>>, vector<16x16xf32>,
    } else {
    }
    %c0_i32_6 = arith.constant 0 : i32
    %9 = arith.cmpi eq, %arg1, %c0_i32_6 : i32
    %10 = arith.extui %9 : i1 to i32
    %c0_i32_7 = arith.constant 0 : i32
    %11 = arith.cmpi ne, %10, %c0_i32_7 : i32
    scf.if %11 {
      %c0_8 = arith.constant 0 : index
      %c0_9 = arith.constant 0 : index
      %12 = vector.load %arg6[%c0_8, %c0_9] : memref<16x16xf32, #tpu.memory_space<vmem>>, vector<16x16xf32>
      %13 = tpu.iota {dimensions = array<i32: 0>} : vector<16x16xi32>
      %14 = tpu.iota {dimensions = array<i32: 1>} : vector<16x16xi32>
      %15 = arith.subi %13, %14 : vector<16x16xi32>
      %16 = math.absi %15 : vector<16x16xi32>
      %c1_i32 = arith.constant 1 : i32
      %17 = vector.broadcast %c1_i32 : i32 to vector<16x16xi32>
      %18 = arith.cmpi sle, %16, %17 : vector<16x16xi32>
      %19 = arith.extui %18 : vector<16x16xi1> to vector<16x16xi32>
      %20 = arith.sitofp %19 : vector<16x16xi32> to vector<16x16xf32>
      %21 = tpu.iota {dimensions = array<i32: 0>} : vector<16x16xi32>
      %22 = tpu.iota {dimensions = array<i32: 1>} : vector<16x16xi32>
      %23 = arith.subi %21, %22 : vector<16x16xi32>
      %24 = math.absi %23 : vector<16x16xi32>
      %c1_i32_10 = arith.constant 1 : i32
      %25 = vector.broadcast %c1_i32_10 : i32 to vector<16x16xi32>
      %26 = arith.cmpi sle, %24, %25 : vector<16x16xi32>
      %27 = arith.extui %26 : vector<16x16xi1> to vector<16x16xi32>
      %28 = arith.sitofp %27 : vector<16x16xi32> to vector<16x16xf32>
      %cst_11 = arith.constant dense<0.000000e+00> : vector<16x16xf32>
      %29 = tpu.matmul %20, %12, %cst_11 {dimension_numbers = #tpu.dot_dimension_numbers<[1], [0], [0], [1], [0, 0, 1, 1], [], []>} : vector<16x16xf32>, vector<16x16xf32>, vector<16x16xf32> -> vector<16x16xf32>
      %cst_12 = arith.constant dense<0.000000e+00> : vector<16x16xf32>
      %30 = tpu.matmul %29, %28, %cst_12 {dimension_numbers = #tpu.dot_dimension_numbers<[1], [0], [0], [1], [0, 0, 1, 1], [], []>} : vector<16x16xf32>, vector<16x16xf32>, vector<16x16xf32> -> vector<16x16xf32>
      %31 = tpu.iota {dimensions = array<i32: 0>} : vector<16x16xi32>
      %32 = tpu.iota {dimensions = array<i32: 1>} : vector<16x16xi32>
      %33 = arith.index_cast %arg0 : i32 to index
      %34 = memref.load %arg2[%33] : memref<2xi32, #tpu.memory_space<smem>>
      %35 = arith.index_cast %arg0 : i32 to index
      %36 = memref.load %arg3[%35] : memref<2xi32, #tpu.memory_space<smem>>
      %37 = vector.broadcast %34 : i32 to vector<16x16xi32>
      %38 = arith.cmpi eq, %31, %37 : vector<16x16xi32>
      %cst_13 = arith.constant 0xFF800000 : f32
      %39 = vector.broadcast %cst_13 : f32 to vector<16x16xf32>
      %40 = arith.select %38, %30, %39 : vector<16x16xi1>, vector<16x16xf32>
      %41 = vector.shape_cast %40 : vector<16x16xf32> to vector<1x16x16xf32>
      %cst_14 = arith.constant dense<0xFF800000> : vector<1xf32>
      %42 = vector.multi_reduction <maximumf>, %41, %cst_14 [1, 2] : vector<1x16x16xf32> to vector<1xf32>
      %43 = vector.shape_cast %42 : vector<1xf32> to vector<1x1x1xf32>
      %44 = vector.extract %43[0, 0, 0] : f32 from vector<1x1x1xf32>
      %45 = vector.broadcast %44 : f32 to vector<1x1xf32>
      %46 = vector.broadcast %34 : i32 to vector<16x16xi32>
      %47 = arith.cmpi eq, %31, %46 : vector<16x16xi32>
      %48 = vector.broadcast %45 : vector<1x1xf32> to vector<16x16xf32>
      %49 = arith.cmpf oeq, %40, %48 : vector<16x16xf32>
      %50 = arith.andi %47, %49 : vector<16x16xi1>
      %c32_i32 = arith.constant 32 : i32
      %51 = vector.broadcast %c32_i32 : i32 to vector<16x16xi32>
      %52 = arith.select %50, %32, %51 : vector<16x16xi1>, vector<16x16xi32>
      %53 = vector.shape_cast %52 : vector<16x16xi32> to vector<1x16x16xi32>
      %cst_15 = arith.constant dense<2147483647> : vector<1xi32>
      %54 = vector.multi_reduction <minsi>, %53, %cst_15 [1, 2] : vector<1x16x16xi32> to vector<1xi32>
      %55 = vector.shape_cast %54 : vector<1xi32> to vector<1x1x1xi32>
      %56 = vector.extract %55[0, 0, 0] : i32 from vector<1x1x1xi32>
      %57 = vector.broadcast %56 : i32 to vector<1x1xi32>
      %58 = vector.broadcast %36 : i32 to vector<16x16xi32>
      %59 = arith.cmpi eq, %32, %58 : vector<16x16xi32>
      %cst_16 = arith.constant 0xFF800000 : f32
      %60 = vector.broadcast %cst_16 : f32 to vector<16x16xf32>
      %61 = arith.select %59, %30, %60 : vector<16x16xi1>, vector<16x16xf32>
      %62 = vector.shape_cast %61 : vector<16x16xf32> to vector<1x16x16xf32>
      %cst_17 = arith.constant dense<0xFF800000> : vector<1xf32>
      %63 = vector.multi_reduction <maximumf>, %62, %cst_17 [1, 2] : vector<1x16x16xf32> to vector<1xf32>
      %64 = vector.shape_cast %63 : vector<1xf32> to vector<1x1x1xf32>
      %65 = vector.extract %64[0, 0, 0] : f32 from vector<1x1x1xf32>
      %66 = vector.broadcast %65 : f32 to vector<1x1xf32>
      %67 = vector.broadcast %36 : i32 to vector<16x16xi32>
      %68 = arith.cmpi eq, %32, %67 : vector<16x16xi32>
      %69 = vector.broadcast %66 : vector<1x1xf32> to vector<16x16xf32>
      %70 = arith.cmpf oeq, %61, %69 : vector<16x16xf32>
      %71 = arith.andi %68, %70 : vector<16x16xi1>
      %c32_i32_18 = arith.constant 32 : i32
      %72 = vector.broadcast %c32_i32_18 : i32 to vector<16x16xi32>
      %73 = arith.select %71, %31, %72 : vector<16x16xi1>, vector<16x16xi32>
      %74 = vector.shape_cast %73 : vector<16x16xi32> to vector<1x16x16xi32>
      %cst_19 = arith.constant dense<2147483647> : vector<1xi32>
      %75 = vector.multi_reduction <minsi>, %74, %cst_19 [1, 2] : vector<1x16x16xi32> to vector<1xi32>
      %76 = vector.shape_cast %75 : vector<1xi32> to vector<1x1x1xi32>
      %77 = vector.extract %76[0, 0, 0] : i32 from vector<1x1x1xi32>
      %78 = vector.broadcast %77 : i32 to vector<1x1xi32>
      %79 = vector.broadcast %57 : vector<1x1xi32> to vector<16x16xi32>
      %80 = arith.cmpi sge, %31, %79 : vector<16x16xi32>
      %c4_i32 = arith.constant 4 : i32
      %81 = vector.broadcast %c4_i32 : i32 to vector<1x1xi32>
      %82 = arith.addi %57, %81 : vector<1x1xi32>
      %83 = vector.broadcast %82 : vector<1x1xi32> to vector<16x16xi32>
      %84 = arith.cmpi slt, %31, %83 : vector<16x16xi32>
      %85 = arith.andi %80, %84 : vector<16x16xi1>
      %86 = vector.broadcast %78 : vector<1x1xi32> to vector<16x16xi32>
      %87 = arith.cmpi sge, %32, %86 : vector<16x16xi32>
      %c8_i32 = arith.constant 8 : i32
      %88 = vector.broadcast %c8_i32 : i32 to vector<1x1xi32>
      %89 = arith.addi %78, %88 : vector<1x1xi32>
      %90 = vector.broadcast %89 : vector<1x1xi32> to vector<16x16xi32>
      %91 = arith.cmpi slt, %32, %90 : vector<16x16xi32>
      %92 = arith.andi %87, %91 : vector<16x16xi1>
      %93 = arith.andi %85, %92 : vector<16x16xi1>
      %cst_20 = arith.constant 0.000000e+00 : f32
      %cst_21 = arith.constant 1.000000e+00 : f32
      %94 = vector.broadcast %cst_20 : f32 to vector<16x16xf32>
      %95 = vector.broadcast %cst_21 : f32 to vector<16x16xf32>
      %96 = arith.select %93, %94, %95 : vector<16x16xi1>, vector<16x16xf32>
      %c0_22 = arith.constant 0 : index
      %c0_23 = arith.constant 0 : index
      %c0_24 = arith.constant 0 : index
      %97 = vector.load %arg5[%c0_22, %c0_23, %c0_24] : memref<1x16x16xf32, #tpu.memory_space<vmem>>, vector<1x16x16xf32>
      %98 = vector.shape_cast %97 : vector<1x16x16xf32> to vector<16x16xf32>
      %99 = vector.shape_cast %96 : vector<16x16xf32> to vector<1x16x16xf32>
      tpu.vector_store %arg5[%c0_22, %c0_23, %c0_24], %99 {strides = array<i32>} : memref<1x16x16xf32, #tpu.memory_space<vmem>>, vector<1x16x16xf32>,
    } else {
    }
    return
  }
  func.func @transform_0(%arg0: i32, %arg1: i32, %arg2: memref<2xi32, #tpu.memory_space<smem>>, %arg3: memref<2xi32, #tpu.memory_space<smem>>) -> (i32, i32, i32, i32) {
    %c0_i32 = arith.constant 0 : i32
    %c0_i32_0 = arith.constant 0 : i32
    %c0_i32_1 = arith.constant 0 : i32
    return %arg0, %arg1, %c0_i32, %c0_i32_0 : i32, i32, i32, i32
  }
  func.func @transform_1(%arg0: i32, %arg1: i32, %arg2: memref<2xi32, #tpu.memory_space<smem>>, %arg3: memref<2xi32, #tpu.memory_space<smem>>) -> (i32, i32, i32) {
    %c0_i32 = arith.constant 0 : i32
    %c0_i32_0 = arith.constant 0 : i32
    %c0_i32_1 = arith.constant 0 : i32
    return %arg0, %c0_i32, %c0_i32_0 : i32, i32, i32
  }
}

</mosaic_0001>

<bundles_post_ra>
// kernel: tpu_custom_call.1
= control target key start
LH: loop header
LB: loop body
LE: loop exit
PB: predicated region body
PF: predicated region fallthrough
CT: control target
= control target key end

     0   :  { %s1187_s0 = inlined_call_operand.hbm [shape: s32[2], index: 0, kind: input, shape index: {}]   ;;  %s1188_s2 = inlined_call_operand.hbm [shape: f32[2,4,16,16], index: 2, kind: input, shape index: {}]   ;;  %s1189_s3 = inlined_call_operand.hbm [shape: f32[2,16,16], index: 3, kind: output, shape index: {}]   ;;  %s1190_s1 = inlined_call_operand.vmem [shape: s32[2], index: 1, kind: input, shape index: {}]  }
   0x1   :  { %s746_s14 = scalar_lea.hbm %s1187_s0, 16 }
   0x2   :  { %p747_p0 = scmp.ne.s32.totalorder %s1187_s0, %s746_s14  ;;  %p750_p1 = scmp.lt.u32.totalorder %s746_s14, %s1187_s0 }
   0x4   :  { %p752_p2 = pnand %p750_p1, %p747_p0 }
   0x6   :  { %755 = shalt.err (!%p752_p2)  }
   0x7   :  { %s884_s19 = smov [#allocation4]   ;;  %s10_s24 = sshll.u32 %s1190_s1, 4  ;;  %s11_s24 = int_to_ptr.vmem [resolvable:$true] %s10_s24 }
   0x8   :  { %9 = dma.hbm_to_smem %s1187_s0, 16, %s884_s19, [#allocation3] }
   0x9   :  { %s756_s25 = scalar_lea.vmem %s11_s24, 16  ;;  %p761_p4 = scmp.lt.s32.totalorder %s11_s24, %s11_s24 }
   0xa   :  { %p757_p3 = scmp.ne.s32.totalorder %s11_s24, %s756_s25  ;;  %p762_p5 = scmp.lt.s32.totalorder %s756_s25, %s756_s25 }
   0xc   :  { %p763_p6 = por %p762_p5, %p761_p4 }
   0xe   :  { %p764_p7 = pnand %p763_p6, %p757_p3 }
  0x10   :  { %767 = shalt.err (!%p764_p7)  }
  0x11   :  { %s885_s26 = smov [#allocation5]  }
  0x12   :  { %13 = dma.vmem_to_smem %s11_s24, 16, %s885_s26, [#allocation3] }
  0x13   :  { %850 = dma.done.wait [#allocation3], 32 }
  0x14   :  { %851 = vsyncadd [#allocation3], 4294967264 }
  0x15   :  { %15 = sfence }
  0x16   :  { %16 = vsyncpa [#allocation7], 0 }
  0x17   :  { %18 = vsyncpa [#allocation7 + $0x1], 0 }
  0x18   :  { %19 = vsyncpa [#allocation8], 0 }
  0x19   :  { %21 = vsyncpa [#allocation8 + $0x1], 0  ;;  %s930_s0 = smov 0   ;;  %s932_s1 = smov 0  }
  0x1a   :  { %s934_s27 = smov 0   ;;  %s936_s28 = smov 0  }
  0x1b   :  { %s938_s29 = smov 0   ;;  %s940_s30 = smov 0  }
  0x1c LB: > { %s610_s4 = sadd.s32 4294967295, %s882_s30   ;;  %s611_s5 = sadd.s32 4294967294, %s882_s30   ;;  %s882_s30 = sphi %s940_s30, %s27_s30   ;;  %s878_s29 = sphi %s938_s29, %s1211_s29   ;;  %s874_s28 = sphi %s936_s28, %s1210_s28   ;;  %s870_s27 = sphi %s934_s27, %s1209_s27   ;;  %s866_s1 = sphi %s932_s1, %s1208_s1   ;;  %s862_s0 = sphi %s930_s0, %s1207_s0  }
  0x1d   : > { %s39_s6 = sadd.s32 1, %s878_s29  ;;  %s48_s7 = sadd.s32 1, %s870_s27 }
  0x1e   : > { %p41_p8 = scmp.ge.s32.totalorder %s39_s6, 2  ;;  %p55_p9 = scmp.ne.s32.totalorder %s870_s27, %s866_s1 }
  0x1f   : > { %p56_p10 = scmp.eq.s32.totalorder %s882_s30, 0  ;;  %p61_p11 = scmp.ne.s32.totalorder %s866_s1, %s862_s0 }
  0x20   : > { %s1213_s6 = smov (%p41_p8, %s39_s6), 0  ;;  %p62_p13 = scmp.eq.s32.totalorder %s610_s4, 0 }
  0x21   : > { %p971_p12 = por %p56_p10, %p55_p9  ;;  %s43_s9 = ssub.s32 %s878_s29, %s1213_s6 }
  0x22   : > { %p85_p0 = scmp.eq.s32.totalorder %s610_s4, 1  ;;  %p46_p1 = scmp.eq.s32.totalorder %s43_s9, 0 }
  0x23   : > { %p977_p2 = por %p62_p13, %p61_p11  ;;  %p91_p4 = scmp.eq.s32.totalorder %s611_s5, 1 }
  0x24   : > { %p981_p3 = por %p85_p0, %p55_p9  ;;  %p687_p7 = scmp.lt.s32.totalorder %s882_s30, 2 }
  0x25   : > { %s986_s12 = scalar_select %p46_p1, %s870_s27, %s48_s7  }
  0x26   : > { %s1194_s11 = scalar_select %p981_p3, 1, 0 }
  0x27   : > { %p988_p5 = por %p91_p4, %p61_p11  ;;  %s111_s14 = sand.u32 1, %s870_s27  }
  0x28   : > { %s614_s15 = sshll.u32 %s111_s14, 6  ;;  %s635_s16 = sshll.u32 %s878_s29, 10 }
  0x29   : > { %s1195_s13 = scalar_select %p988_p5, 1, 0 }
  0x2a   : > { %s999_s19 = scalar_lea.hbm %s1188_s2, %s635_s16  ;;  %s115_s20 = scalar_lea.vmem [#allocation6], %s614_s15 }
  0x2b   : > { %s125_s21 = sshll.u32 %s115_s20, 4  ;;  %p1005_p8 = pnand %p687_p7, %p971_p12  ;;  %s1001_s21 = int_to_ptr.vmem [resolvable:$true] %s125_s21 }
  0x2c   : > { %s1010_s23 = scalar_lea.sflag [#allocation7], %s111_s14  ;;  %s768_s24 = scalar_lea.hbm %s999_s19, 1024 }
  0x2d   : > { %p769_p10 = scmp.ne.s32.totalorder %s999_s19, %s768_s24  ;;  %p770_p11 = pneg %p1005_p8 }
  0x2e   : > { %s773_s4 = scalar_lea.hbm %s1188_s2, 2048  ;;  %p774_p12 = scmp.lt.u32.totalorder %s999_s19, %s1188_s2 }
  0x2f   : > { %p771_p13 = pnand %p770_p11, %p769_p10  ;;  %p775_p1 = scmp.lt.u32.totalorder %s773_s4, %s768_s24 }
  0x30   : > { %p777_p7 = scmp.lt.u32.totalorder %s768_s24, %s999_s19 }
  0x31   : > { %p772_p0 = pneg %p771_p13  ;;  %p776_p4 = por %p775_p1, %p774_p12 }
  0x33   : > { %p778_p6 = por %p777_p7, %p776_p4 }
  0x35   : > { %p779_p9 = pnand %p778_p6, %p772_p0 }
  0x37   : > { %782 = shalt.err (!%p779_p9)
}
  0x38   : > { %s783_s8 = scalar_lea.vmem %s1001_s21, 1024  ;;  %s886_s9 = smov [#allocation6]  }
  0x39   : > { %p784_p10 = scmp.ne.s32.totalorder %s1001_s21, %s783_s8  ;;  %s788_s14 = sshll.u32 %s886_s9, 4  ;;  %s789_s14 = int_to_ptr.vmem [resolvable:$false] %s788_s14 }
  0x3a   : > { %s790_s15 = scalar_lea.vmem %s789_s14, 2048  ;;  %p791_p3 = scmp.lt.s32.totalorder %s1001_s21, %s789_s14 }
  0x3b   : > { %p786_p13 = pnand %p784_p10, %p770_p11  ;;  %p792_p12 = scmp.lt.s32.totalorder %s790_s15, %s783_s8 }
  0x3d   : > { %p787_p5 = pneg %p786_p13  ;;  %p793_p1 = por %p792_p12, %p791_p3 }
  0x3f   : > { %p794_p4 = pnand %p793_p1, %p787_p5 }
  0x41   : > { %797 = shalt.err (!%p794_p4)
}
  0x42   : > { %s887_s16 = smov 128   ;;  %s888_s17 = smov 8  }
  0x43   : > { %682 = dma.hbm_to_vmem [thread:$0]  (!%p1005_p8), %s999_s19, 1024, %s1001_s21, %s1010_s23, %s887_s16, %s887_s16, %s888_s17  }
  0x44   : > { %p133_p6 = scmp.lt.s32.totalorder %s882_s30, 3  ;;  %p1197_p9 = scmp.ge.s32.totalorder %s882_s30, 1 }
  0x46   : > { %p134_p11 = pnand %p1197_p9, %p133_p6 }
  0x47   : > { %s1042_s18 = sand.u32 (!%p134_p11), 1, %s866_s1  }
  0x48   : > { %137 = sbr.rel (%p134_p11) target bundleno = 1491 (0x5d3), region = 24  ;;  %s618_s20 = sshll.u32 (!%p134_p11), %s1042_s18, 6 }
  0x49   : > { %s140_s24 = scalar_lea.sflag (!%p134_p11), [#allocation7], %s1042_s18  ;;  %s143_s25 = scalar_lea.vmem (!%p134_p11), [#allocation6], %s618_s20 }
  0x4f   : > { %853 = dma.done.wait (%p977_p2), %s140_s24, 1024  }
  0x50   : > { %855 = vsyncadd (%p977_p2), %s140_s24, 4294966272  ;;  %v207_v0 = vlaneseq  ;;  %vm171_vm0 = vcmask 130048   ;;  %v163_v7 = vld [vmem:[%s143_s25] sm:$0xff]  ;;  %v164_v8 = vld [vmem:[%s143_s25 + $0x8] sm:$0xff]  ;;  %v889_v30 = vmov 0.0   ;;  %s388_s10 = sld [smem:[#allocation4 + %s874_s28]] }
  0x51   : > { %v165_v9 = vld [vmem:[%s143_s25 + $0x10] sm:$0xff]  ;;  %v166_v10 = vld [vmem:[%s143_s25 + $0x18] sm:$0xff]  ;;  %v167_v11 = vld [vmem:[%s143_s25 + $0x20] sm:$0xff]  ;;  %v172_v13 = vsel %vm171_vm0, %v163_v7, 0.0  ;;  %v179_v15 = vsel %vm171_vm0, %v164_v8, 0.0  ;;  %s389_s21 = sld [smem:[#allocation5 + %s874_s28]] }
  0x52   : > { %v1050_v1 = vshrl.u32 %v207_v0, 7  ;;  %v1052_v2 = vand.u32 127, %v207_v0  ;;  %v168_v12 = vld [vmem:[%s143_s25 + $0x28] sm:$0xff]  ;;  %v173_v14 = vsel %vm171_vm0, %v165_v9, 0.0  ;;  %v169_v17 = vld [vmem:[%s143_s25 + $0x30] sm:$0xff]  ;;  %v170_v18 = vld [vmem:[%s143_s25 + $0x38] sm:$0xff] }
  0x53   : > { %v174_v19 = vadd.f32 %v173_v14, %v172_v13  ;;  %v175_v20 = vsel %vm171_vm0, %v167_v11, 0.0  ;;  %v180_v21 = vsel %vm171_vm0, %v166_v10, 0.0  ;;  %v182_v22 = vsel %vm171_vm0, %v168_v12, 0.0  ;;  %s619_s26 = sshll.u32 %s1042_s18, 4  ;;  %s636_s8 = sshll.u32 %s874_s28, 8 }
  0x54   : > { %v1055_v3 = vadd.s32 8, %v1050_v1  ;;  %v212_v4 = vsub.s32 %v1050_v1, %v1052_v2  ;;  %v177_v23 = vsel %vm171_vm0, %v169_v17, 0.0  ;;  %v181_v24 = vadd.f32 %v180_v21, %v179_v15  ;;  %s161_s5 = scalar_lea.vmem [#allocation9], %s619_s26  ;;  %s1136_s15 = scalar_lea.hbm %s1189_s3, %s636_s8 }
  0x55   : > { %v176_v26 = vadd.f32 %v175_v20, %v174_v19  ;;  %v184_v27 = vsel %vm171_vm0, %v170_v18, 0.0  ;;  %v890_v34 = vmov 1.0|1.0   ;;  %s526_s7 = sshll.u32 %s161_s5, 4  ;;  %s513_s28 = scalar_lea.sflag [#allocation8], %s1042_s18  ;;  %s1131_s7 = int_to_ptr.vmem [resolvable:$true] %s526_s7 }
  0x56   : > { %v213_v5 = vsub.s32 %v1055_v3, %v1052_v2  ;;  %v215_v6 = vsub.s32 0, %v212_v4  ;;  %v183_v28 = vadd.f32 %v182_v22, %v181_v24  ;;  %v390_v41 = vstv %s388_s10  ;;  %s798_s16 = scalar_lea.vmem %s1131_s7, 256  ;;  %p1204_p3 = scmp.ne.s32.totalorder %s1194_s11, 0 }
  0x57   : > { %v178_v32 = vadd.f32 %v177_v23, %v176_v26  ;;  %vm1077_vm4 = vcmp.eq.s32.totalorder %v1055_v3, %v390_v41  ;;  %vm1082_vm5 = vcmp.eq.s32.totalorder %v1050_v1, %v390_v41  ;;  %p799_p2 = scmp.ne.s32.totalorder %s1131_s7, %s798_s16  ;;  %s892_s17 = smov [#allocation9]  }
  0x58   : > { %v620_v16 = vmin.u32 %v215_v6, %v212_v4  ;;  %v218_v25 = vsub.s32 0, %v213_v5  ;;  %v185_v33 = vadd.f32 %v184_v27, %v183_v28  ;;  %s802_s20 = sshll.u32 %s892_s17, 4  ;;  %s803_s20 = int_to_ptr.vmem [resolvable:$false] %s802_s20 }
  0x59   : > { %190 = vst.msk [vmem:[#allocation2] sm:$0xff] %vm171_vm0, %v178_v32  ;;  %p800_p5 = pnand %p799_p2, %p1204_p3  ;;  %s804_s24 = scalar_lea.vmem %s803_s20, 512 }
  0x5a   : > { %vm220_vm1 = vcmp.le.s32.totalorder %v620_v16, 1  ;;  %v621_v29 = vmin.u32 %v218_v25, %v213_v5  ;;  %191 = vst.msk [vmem:[#allocation2 + $0x8] sm:$0xff] %vm171_vm0, %v185_v33  ;;  %v443_v5 = vstv %s389_s21  ;;  %p805_p0 = scmp.lt.s32.totalorder %s1131_s7, %s803_s20  ;;  %p806_p7 = scmp.lt.s32.totalorder %s804_s24, %s798_s16 }
  0x5b   : > { %v622_v31 = vsel %vm220_vm1, 1.0, %v889_v30  ;;  %vm1102_vm11 = vcmp.eq.s32.totalorder %v1052_v2, %v443_v5  ;;  %p801_p8 = pneg %p800_p5 }
  0x5c   : > { %649 = vmatprep.mubr.msk.f32.mxu0 %vm171_vm0, %v622_v31  ;;  %vm221_vm2 = vcmp.le.s32.totalorder %v621_v29, 1  ;;  %p807_p10 = por %p806_p7, %p805_p0 }
  0x5d   : > { %vm663_vm3 = vmpackc.low %vm221_vm2, %vm220_vm1  ;;  %v623_v38 = vsel %vm221_vm2, 1.0, %v889_v30 }
  0x5e   : > { %664 = vmatprep.subr.msk.bf16.mxu1 %vm663_vm3, %v890_v34  ;;  %p808_p13 = pnand %p807_p10, %p801_p8 }
  0x5f   : > { %666 = vmatpush3.bf16.msk.msra.mxu1 %vm663_vm3, %v890_v34 }
  0x60   : > { %v205_v35 = vld [vmem:[#allocation2] sm:$0xff] }
  0x61   : > { %v206_v36 = vld [vmem:[#allocation2 + $0x8] sm:$0xff] }
  0x62   : > { %v659_v37 = vpack.c.bf16 %v206_v36, %v205_v35 }
  0x64   : > { %660 = vmatprep.subr.bf16.mxu0 %v659_v37 }
  0x65   : > { %662 = vmatpush3.bf16.msra.mxu0 %v659_v37 }
  0x68   : > { %650 = vmatmul.mubr.msk.f32.vlgmr.msra.gmra.mrb[0].mxu0 %vm171_vm0, %v623_v38 }
 0x13b   : > { %v651_v39 = vpop.f32.mrb[0].mxu0 }
 0x13c   : > { %v298_v40 = vpop.f32.mrb[1].mxu0 }
 0x13d   : > { %656 = vmatprep.mubr.msk.f32.mxu1 %vm171_vm0, %v298_v40 }
 0x13e   : > { %657 = vmatmul.mubr.msk.f32.vlgmr.msra.gmra.mrb[0].mxu1 %vm171_vm0, %v651_v39 }
 0x211   : > { %v658_v44 = vpop.f32.mrb[0].mxu1 }
 0x212   : > { %v394_v45 = vsel %vm1077_vm4, %v658_v44, -inf  ;;  %v379_v46 = vpop.f32.mrb[1].mxu1  ;;  %v446_v8 = vsel %vm1102_vm11, %v658_v44, -inf }
 0x213   : > { %v393_v47 = vsel %vm1082_vm5, %v379_v46, -inf  ;;  %v396_v48 = vsel %vm171_vm0, %v394_v45, -inf  ;;  %v445_v9 = vsel %vm1102_vm11, %v379_v46, -inf  ;;  %v448_v14 = vsel %vm171_vm0, %v446_v8, -inf }
 0x214   : > { %v395_v49 = vsel %vm171_vm0, %v393_v47, -inf  ;;  %v447_v12 = vsel %vm171_vm0, %v445_v9, -inf }
 0x215   : > { %v397_v50 = vmax.f32 %v395_v49, %v396_v48  ;;  %v449_v15 = vmax.f32 %v447_v12, %v448_v14 }
 0x217   : > { %398 = vmax.xlane.f32.xlu0 %v397_v50 }
 0x2a4   : > { %v399_v51 = vpop.xlane.xlu0 %398 }
 0x2a5   : > { %v400_v52 = vrot.slane %v399_v51, 4 }
 0x2a7   : > { %v401_v53 = vmax.f32 %v399_v51, %v400_v52 }
 0x2a9   : > { %v402_v54 = vrot.slane %v401_v53, 2 }
 0x2ab   : > { %v403_v55 = vmax.f32 %v401_v53, %v402_v54 }
 0x2ad   : > { %v404_v56 = vrot.slane %v403_v55, 1 }
 0x2af   : > { %v405_v57 = vmax.f32 %v403_v55, %v404_v56 }
 0x2b1   : > { %667 = vpush %v405_v57 }
 0x2e2   : > { %s668_s19 = spop %667 }
 0x2e3   : > { %v407_v58 = vstv %s668_s19 }
 0x2e4   : > { %vm408_vm6 = vcmp.eq.f32.partialorder %v393_v47, %v407_v58  ;;  %vm409_vm7 = vcmp.eq.f32.partialorder %v394_v45, %v407_v58 }
 0x2e5   : > { %vm410_vm8 = vmand %vm1082_vm5, %vm408_vm6 }
 0x2e6   : > { %vm411_vm9 = vmand %vm1077_vm4, %vm409_vm7  ;;  %v412_v59 = vsel %vm410_vm8, %v1052_v2, 32 }
 0x2e7   : > { %v413_v60 = vsel %vm411_vm9, %v1052_v2, 32  ;;  %v414_v61 = vsel %vm171_vm0, %v412_v59, 2147483647 }
 0x2e8   : > { %v415_v62 = vsel %vm171_vm0, %v413_v60, 2147483647 }
 0x2e9   : > { %vm416_vm10 = vcmp.lt.s32.totalorder %v414_v61, %v415_v62 }
 0x2ea   : > { %v417_v63 = vsel %vm416_vm10, %v414_v61, %v415_v62 }
 0x2eb   : > { %v419_v0 = vshra.s32 %v417_v63, 16  ;;  %v418_v7 = vand.u32 65535, %v417_v63 }
 0x2ed   : > { %v421_v4 = vcvt.s32.f32 %v419_v0  ;;  %v420_v11 = vcvt.s32.f32 %v418_v7 }
 0x2ef   : > { %422 = vmin.xlane.f32.xlu0 %v421_v4 }
 0x37c   : > { %v423_v10 = vpop.xlane.xlu0 %422 }
 0x37d   : > { %vm424_vm12 = vcmp.eq.f32.partialorder %v421_v4, %v423_v10  ;;  %v429_v16 = vcvt.f32.s32 %v423_v10 }
 0x37e   : > { %v425_v13 = vsel %vm424_vm12, %v420_v11, inf }
 0x37f   : > { %426 = vmin.xlane.f32.xlu1 %v425_v13  ;;  %v430_v18 = vshll.u32 %v429_v16, 16 }
 0x383   : > { %450 = vmax.xlane.f32.xlu1 %v449_v15 }
 0x40c   : > { %v427_v17 = vpop.xlane.xlu1 %426 }
 0x40d   : > { %v428_v19 = vcvt.f32.s32 %v427_v17 }
 0x40f   : > { %v431_v20 = vadd.s32 %v430_v18, %v428_v19 }
 0x410   : > { %v451_v21 = vpop.xlane.xlu1 %450 }
 0x411   : > { %v432_v22 = vrot.slane %v431_v20, 4  ;;  %v452_v23 = vrot.slane %v451_v21, 4 }
 0x413   : > { %vm433_vm13 = vcmp.lt.s32.totalorder %v431_v20, %v432_v22  ;;  %v453_v24 = vmax.f32 %v451_v21, %v452_v23 }
 0x414   : > { %v434_v25 = vsel %vm433_vm13, %v431_v20, %v432_v22 }
 0x415   : > { %v454_v26 = vrot.slane %v453_v24, 2  ;;  %v435_v27 = vrot.slane %v434_v25, 2 }
 0x417   : > { %vm436_vm14 = vcmp.lt.s32.totalorder %v434_v25, %v435_v27  ;;  %v455_v28 = vmax.f32 %v453_v24, %v454_v26 }
 0x418   : > { %v437_v29 = vsel %vm436_vm14, %v434_v25, %v435_v27 }
 0x419   : > { %v438_v30 = vrot.slane %v437_v29, 1  ;;  %v456_v31 = vrot.slane %v455_v28, 1 }
 0x41b   : > { %vm439_vm15 = vcmp.lt.s32.totalorder %v437_v29, %v438_v30  ;;  %v457_v32 = vmax.f32 %v455_v28, %v456_v31 }
 0x41c   : > { %v440_v33 = vsel %vm439_vm15, %v437_v29, %v438_v30 }
 0x41d   : > { %669 = vpush %v440_v33 }
 0x41e   : > { %671 = vpush %v457_v32 }
 0x44e   : > { %s1112_s22 = spop %669 }
 0x44f   : > { %s672_s23 = spop %671  ;;  %v442_v57 = vstv %s1112_s22 }
 0x450   : > { %v459_v34 = vstv %s672_s23  ;;  %v497_v58 = vadd.s32 4, %v442_v57  ;;  %vm495_vm12 = vcmp.ge.s32.totalorder %v1050_v1, %v442_v57  ;;  %vm496_vm13 = vcmp.ge.s32.totalorder %v1055_v3, %v442_v57 }
 0x451   : > { %vm460_vm1 = vcmp.eq.f32.partialorder %v445_v9, %v459_v34  ;;  %vm461_vm2 = vcmp.eq.f32.partialorder %v446_v8, %v459_v34 }
 0x452   : > { %vm462_vm3 = vmand %vm1102_vm11, %vm460_vm1  ;;  %vm498_vm10 = vcmp.lt.s32.totalorder %v1050_v1, %v497_v58 }
 0x453   : > { %vm463_vm4 = vmand %vm1102_vm11, %vm461_vm2  ;;  %v464_v35 = vsel %vm462_vm3, %v1050_v1, 32  ;;  %vm499_vm11 = vcmp.lt.s32.totalorder %v1055_v3, %v497_v58  ;;  %v891_v1 = vmov 1.0  }
 0x454   : > { %v465_v36 = vsel %vm463_vm4, %v1055_v3, 32  ;;  %v466_v37 = vsel %vm171_vm0, %v464_v35, 2147483647  ;;  %vm500_vm14 = vmand %vm495_vm12, %vm498_vm10 }
 0x455   : > { %v467_v38 = vsel %vm171_vm0, %v465_v36, 2147483647  ;;  %vm501_vm15 = vmand %vm496_vm13, %vm499_vm11 }
 0x456   : > { %vm468_vm5 = vcmp.lt.s32.totalorder %v466_v37, %v467_v38 }
 0x457   : > { %v469_v39 = vsel %vm468_vm5, %v466_v37, %v467_v38 }
 0x458   : > { %v471_v40 = vshra.s32 %v469_v39, 16  ;;  %v470_v42 = vand.u32 65535, %v469_v39 }
 0x45a   : > { %v473_v41 = vcvt.s32.f32 %v471_v40  ;;  %v472_v44 = vcvt.s32.f32 %v470_v42 }
 0x45c   : > { %474 = vmin.xlane.f32.xlu0 %v473_v41 }
 0x4e9   : > { %v475_v43 = vpop.xlane.xlu0 %474 }
 0x4ea   : > { %vm476_vm6 = vcmp.eq.f32.partialorder %v473_v41, %v475_v43  ;;  %v481_v46 = vcvt.f32.s32 %v475_v43 }
 0x4eb   : > { %v477_v45 = vsel %vm476_vm6, %v472_v44, inf }
 0x4ec   : > { %478 = vmin.xlane.f32.xlu1 %v477_v45  ;;  %v482_v48 = vshll.u32 %v481_v46, 16 }
 0x579   : > { %v479_v47 = vpop.xlane.xlu1 %478 }
 0x57a   : > { %v480_v49 = vcvt.f32.s32 %v479_v47 }
 0x57c   : > { %v483_v50 = vadd.s32 %v482_v48, %v480_v49 }
 0x57e   : > { %v484_v51 = vrot.slane %v483_v50, 4 }
 0x580   : > { %vm485_vm7 = vcmp.lt.s32.totalorder %v483_v50, %v484_v51 }
 0x581   : > { %v486_v52 = vsel %vm485_vm7, %v483_v50, %v484_v51 }
 0x582   : > { %v487_v53 = vrot.slane %v486_v52, 2 }
 0x584   : > { %vm488_vm8 = vcmp.lt.s32.totalorder %v486_v52, %v487_v53 }
 0x585   : > { %v489_v54 = vsel %vm488_vm8, %v486_v52, %v487_v53 }
 0x586   : > { %v490_v55 = vrot.slane %v489_v54, 1 }
 0x588   : > { %vm491_vm9 = vcmp.lt.s32.totalorder %v489_v54, %v490_v55 }
 0x589   : > { %v492_v56 = vsel %vm491_vm9, %v489_v54, %v490_v55 }
 0x58a   : > { %673 = vpush %v492_v56 }
 0x5bb   : > { %s674_s4 = spop %673 }
 0x5bc   : > { %v494_v59 = vstv %s674_s4 }
 0x5bd   : > { %v503_v60 = vadd.s32 8, %v494_v59  ;;  %vm502_vm1 = vcmp.ge.s32.totalorder %v1052_v2, %v494_v59 }
 0x5bf   : > { %vm504_vm2 = vcmp.lt.s32.totalorder %v1052_v2, %v503_v60 }
 0x5c0   : > { %vm505_vm3 = vmand %vm502_vm1, %vm504_vm2 }
 0x5c1   : > { %vm506_vm4 = vmand %vm500_vm14, %vm505_vm3 }
 0x5c2   : > { %vm507_vm5 = vmand %vm501_vm15, %vm505_vm3  ;;  %v508_v3 = vsel %vm506_vm4, 0.0, %v891_v1 }
 0x5c3   : > { %v509_v61 = vsel %vm507_vm5, 0.0, %v891_v1  ;;  %510 = vst.msk [vmem:[%s161_s5] sm:$0xff] %vm171_vm0, %v508_v3 }
 0x5c4   : > { %511 = vst.msk [vmem:[%s161_s5 + $0x8] sm:$0xff] %vm171_vm0, %v509_v61 }
 0x5c5   : > { %811 = shalt.err (!%p808_p13)
}
 0x5c6   : > { %s812_s25 = scalar_lea.hbm %s1136_s15, 256  ;;  %s816_s21 = scalar_lea.hbm %s1189_s3, 512 }
 0x5c7   : > { %p813_p12 = scmp.ne.s32.totalorder %s1136_s15, %s812_s25  ;;  %p817_p6 = scmp.lt.u32.totalorder %s1136_s15, %s1189_s3 }
 0x5c8   : > { %p818_p9 = scmp.lt.u32.totalorder %s816_s21, %s812_s25  ;;  %p820_p2 = scmp.lt.u32.totalorder %s812_s25, %s1136_s15 }
 0x5c9   : > { %p814_p1 = pnand %p813_p12, %p1204_p3 }
 0x5ca   : > { %p819_p11 = por %p818_p9, %p817_p6 }
 0x5cb   : > { %p815_p4 = pneg %p814_p1 }
 0x5cc   : > { %p821_p5 = por %p820_p2, %p819_p11 }
 0x5ce   : > { %p822_p8 = pnand %p821_p5, %p815_p4 }
 0x5d0   : > { %825 = shalt.err (!%p822_p8)
}
 0x5d1   : > { %s893_s26 = smov 128   ;;  %s894_s4 = smov 8  }
 0x5d2   : > { %677 = dma.vmem_to_hbm [thread:$0]  (%p1204_p3), %s1131_s7, 256, %s1136_s15, %s513_s28, %s893_s26, %s893_s26, %s894_s4  }
 0x5d3 PF: > { %s541_s5 = sand.u32 1, %s862_s0   ;;  %p1205_p0 = scmp.ne.s32.totalorder %s1195_s13, 0 }
 0x5d4   : > { %p1206_p7 = scmp.ge.s32.totalorder %s882_s30, 2  ;;  %s542_s8 = scalar_lea.sflag [#allocation8], %s541_s5 }
 0x5d6   : > { %p684_p10 = pnand %p1206_p7, %p1205_p0 }
 0x5d8   : > { %857 = dma.done.wait (!%p684_p10), %s542_s8, 256  }
 0x5d9   : > { %859 = vsyncadd (!%p684_p10), %s542_s8, 4294967040  ;;  %s27_s30 = sadd.s32 1, %s882_s30   ;;  %s1207_s0 = smov %s866_s1 }
 0x5da   : > { %p24_p13 = scmp.ge.s32.totalorder %s27_s30, 4   ;;  %s1208_s1 = smov %s870_s27 }
 0x5db   : > { %s1209_s27 = smov %s986_s12  ;;  %s1210_s28 = smov %s878_s29 }
 0x5dc   : > { %s1211_s29 = smov %s1213_s6  ;;  %26 = sbr.rel (!%p24_p13) target bundleno = 28 (0x1c), region = 81 }
 0x5e3   :  { %547 = vsyncpa [#allocation7], 1 }
 0x5e4   :  { %549 = vsyncpa [#allocation7 + $0x1], 1 }
 0x5e5   :  { %550 = vsyncpa [#allocation8], 1 }
 0x5e6   :  { %552 = vsyncpa [#allocation8 + $0x1], 1 }

</bundles_post_ra>
